<compile_context>
chip_gen: v7x
topology: tpu7x:2x2x1
jax: 0.10.0
libtpu: 0.0.40
codegen_flags: <defaults>
</compile_context>

<pallas_src>
import functools
import math
import re

import jax
import jax.numpy as jnp
from jax import lax
from jax.experimental import pallas as pl
from jax.experimental.pallas import tpu as pltpu

_INT32_MAX = 2147483647


def _ceil_to(x: int, m: int) -> int:
    return (x + m - 1) // m * m


def _floor_to(x: int, m: int) -> int:
    return x // m * m


def _tpu_generation() -> int:
    try:
        kind = str(jax.devices()[0].device_kind)
    except Exception:
        return 6
    m = re.search(r"(\d+)", kind)
    return int(m.group(1)) if m else 6


_GEN = _tpu_generation()

if _GEN >= 7:          # v7x: 64 MiB physical VMEM, 32 MiB default scoped
    _VMEM_LIMIT = 32 * 1024 * 1024
    _VMEM_BUDGET = 24 * 1024 * 1024
elif _GEN >= 4:        # v4 / v5e / v6e: 128 MiB physical VMEM
    _VMEM_LIMIT = 64 * 1024 * 1024
    _VMEM_BUDGET = 48 * 1024 * 1024
else:
    _VMEM_LIMIT = 16 * 1024 * 1024
    _VMEM_BUDGET = 12 * 1024 * 1024

_BLOCK_BUDGET = 2 * 1024 * 1024   # target bytes per pipelined input block (mid path)
_TM_MAX = 2048                    # row-tile cap (keeps the lane-padded (tm,1) out col small)


def _compute_dtype(dtype):
    """dtype used in-kernel for max / compare (widen only where required)."""
    if dtype == jnp.bfloat16:
        # v6e/v7x have native bf16 VPU compare/max; v5e and older do not.
        return jnp.bfloat16 if _GEN >= 6 else jnp.float32
    if jnp.issubdtype(dtype, jnp.floating):
        return jnp.float32
    if jnp.issubdtype(dtype, jnp.unsignedinteger):
        return jnp.uint32
    return jnp.int32          # signed ints, bool


def _identity_for(cdtype):
    """Identity value for the running-max update in `cdtype`."""
    if jnp.issubdtype(cdtype, jnp.floating):
        return float("-inf")
    return int(jnp.iinfo(cdtype).min)   # 0 for uint32, -2**31 for int32


# --------------------------------------------------------------------------
# Kernels
# --------------------------------------------------------------------------
def _argmax_last_kernel(x_ref, o_ref, *, cdtype):
    """Argmax over the last axis; the whole reduction axis is in one block."""
    x = x_ref[...].astype(cdtype)                              # (TM, K)
    k_len = x.shape[-1]
    m = jnp.max(x, axis=-1, keepdims=True)                     # (TM, 1)
    col = lax.broadcasted_iota(jnp.int32, (1, k_len), 1)       # broadcast row
    # First-occurrence tie break (matches torch.argmax).
    o_ref[...] = jnp.min(jnp.where(x == m, col, jnp.int32(k_len)),
                         axis=-1, keepdims=True)               # (TM, 1)


def _argmax_last_acc_kernel(x_ref, o_ref, m_sc, i_sc, *,
                            tk, k_len, cdtype, init_val, ragged):
    """Argmax over a K-tiled last axis; running (max, argmax) in VMEM scratch."""
    kblk = pl.program_id(1)

    @pl.when(kblk == 0)
    def _init():
        m_sc[...] = jnp.full(m_sc.shape, init_val, m_sc.dtype)
        i_sc[...] = jnp.zeros(i_sc.shape, jnp.int32)

    x = x_ref[...].astype(cdtype)                              # (TM, TK)
    col = lax.broadcasted_iota(jnp.int32, (1, tk), 1) + kblk * tk
    if ragged:
        # Mask the out-of-range tail of the last K block with the identity:
        # no extra HBM padding pass, and the padding can never win the strict
        # `>` update below.
        x = jnp.where(col < k_len, x, jnp.asarray(init_val, cdtype))
    m_loc = jnp.max(x, axis=-1, keepdims=True)                 # (TM, 1)
    i_loc = jnp.min(jnp.where(x == m_loc, col, _INT32_MAX),
                    axis=-1, keepdims=True)                    # (TM, 1)
    better = m_loc > m_sc[...]        # strict `>`: earlier K block wins ties
    m_sc[...] = jnp.where(better, m_loc, m_sc[...])
    i_sc[...] = jnp.where(better, i_loc, i_sc[...])

    @pl.when(kblk == pl.num_programs(1) - 1)
    def _finalize():
        o_ref[...] = i_sc[...]


def _argmax_mid_kernel(x_ref, o_ref, *, cdtype):
    """Argmax over the middle axis of a (TO, K, TI) block, vectorized over TO.

    `inner` (TI) is on the 128-lane axis, so the (TO, TI) index result is
    produced and stored lane-dense with a single unmasked store per block.
    """
    x = x_ref[...].astype(cdtype)                              # (TO, K, TI)
    k_len = x.shape[1]
    m = jnp.max(x, axis=1, keepdims=True)                      # (TO, 1, TI)
    row = lax.broadcasted_iota(jnp.int32, (1, k_len, 1), 1)
    o_ref[...] = jnp.min(jnp.where(x == m, row, jnp.int32(k_len)),
                         axis=1)                               # (TO, TI)


def _argmax_mid_acc_kernel(x_ref, o_ref, m_sc, i_sc, *,
                           tk, k_len, cdtype, init_val, ragged):
    """K-tiled argmax over the middle axis; running (max, argmax) per (TO, TI)."""
    kblk = pl.program_id(2)

    @pl.when(kblk == 0)
    def _init():
        m_sc[...] = jnp.full(m_sc.shape, init_val, m_sc.dtype)
        i_sc[...] = jnp.zeros(i_sc.shape, jnp.int32)

    x = x_ref[...].astype(cdtype)                              # (TO, TK, TI)
    row = lax.broadcasted_iota(jnp.int32, (1, tk, 1), 1) + kblk * tk
    if ragged:
        x = jnp.where(row < k_len, x, jnp.asarray(init_val, cdtype))
    m_loc = jnp.max(x, axis=1)                                 # (TO, TI)
    i_loc = jnp.min(jnp.where(x == m_loc[:, None, :], row, _INT32_MAX),
                    axis=1)                                    # (TO, TI)
    better = m_loc > m_sc[...]
    m_sc[...] = jnp.where(better, m_loc, m_sc[...])
    i_sc[...] = jnp.where(better, i_loc, i_sc[...])

    @pl.when(kblk == pl.num_programs(2) - 1)
    def _finalize():
        o_ref[...] = i_sc[...]


# --------------------------------------------------------------------------
# pallas_call wrappers
# --------------------------------------------------------------------------
def _argmax_last(x2d: jax.Array, *, force_acc: bool = False,
                 test_tk: int | None = None) -> jax.Array:
    """Row-wise argmax over the last axis of [rows, K] -> (rows, 1) int32."""
    rows, k_len = x2d.shape
    itemsize = x2d.dtype.itemsize
    cdtype = _compute_dtype(x2d.dtype)
    init_val = _identity_for(cdtype)

    k_lanes = _ceil_to(k_len, 128)      # lane-padded K inside VMEM
    # DB input + DB lane-padded (tm, 1) output column, per row of tile.
    per_row = 2 * k_lanes * itemsize + 2 * 128 * 4
    single_k = (not force_acc) and (128 * per_row <= _VMEM_BUDGET)

    flops = 2 * rows * k_len
    bytes_hbm = rows * k_len * itemsize + rows * 4

    if single_k:
        tm = _floor_to(_VMEM_BUDGET // per_row, 8)
        tm = max(8, min(tm, _TM_MAX))
        if rows >= 2048:
            # >= 8 row blocks: feeds both v7x TensorCores and keeps the input
            # DMA pipeline busy; per-step overhead stays negligible.
            tm = min(tm, max(256, _ceil_to(rows // 8, 8)))
        if rows < 8:
            tm = rows
        else:
            tm = min(tm, max(8, _floor_to(rows, 8)))
        grid = (pl.cdiv(rows, tm),)
        kernel = functools.partial(_argmax_last_kernel, cdtype=cdtype)
        return pl.pallas_call(
            kernel,
            out_shape=jax.ShapeDtypeStruct((rows, 1), jnp.int32),
            grid_spec=pltpu.PrefetchScalarGridSpec(
                num_scalar_prefetch=0,
                grid=grid,
                in_specs=[pl.BlockSpec((tm, k_len), lambda i: (i, 0))],
                out_specs=pl.BlockSpec((tm, 1), lambda i: (i, 0)),
            ),
            compiler_params=pltpu.CompilerParams(
                dimension_semantics=("parallel",),
                vmem_limit_bytes=_VMEM_LIMIT,
            ),
            cost_estimate=pl.CostEstimate(
                flops=flops, transcendentals=0, bytes_accessed=bytes_hbm),
        )(x2d)

    # ---- K-tiled accumulator path (vocab-sized reduction axis) ----
    acc_itemsize = 2 if cdtype == jnp.bfloat16 else 4
    tm = 1024
    if rows < 8:
        tm = rows
    else:
        tm = min(tm, max(8, _floor_to(rows, 8)))
    if rows >= 256:
        # make sure the parallel (row) axis has >= 2 blocks for the v7x megacore
        tm = min(tm, max(128, _ceil_to(pl.cdiv(rows, 2), 8)))
    overhead = 2 * tm * 128 * 4 + tm * 128 * (acc_itemsize + 4)
    in_budget = max(256 * 1024, _VMEM_BUDGET - overhead)
    tk = _floor_to(in_budget // (2 * max(8, tm) * itemsize), 128)
    tk = max(128, min(tk, 8192, _ceil_to(k_len, 128)))
    if test_tk is not None:
        tk = test_tk
    ragged = (k_len % tk) != 0
    grid = (pl.cdiv(rows, tm), pl.cdiv(k_len, tk))
    kernel = functools.partial(
        _argmax_last_acc_kernel, tk=tk, k_len=k_len, cdtype=cdtype,
        init_val=init_val, ragged=ragged)
    return pl.pallas_call(
        kernel,
        out_shape=jax.ShapeDtypeStruct((rows, 1), jnp.int32),
        grid_spec=pltpu.PrefetchScalarGridSpec(
            num_scalar_prefetch=0,
            grid=grid,
            in_specs=[pl.BlockSpec((tm, tk), lambda i, j: (i, j))],
            out_specs=pl.BlockSpec((tm, 1), lambda i, j: (i, 0)),
            scratch_shapes=[pltpu.VMEM((tm, 1), cdtype),
                            pltpu.VMEM((tm, 1), jnp.int32)],
        ),
        compiler_params=pltpu.CompilerParams(
            dimension_semantics=("parallel", "arbitrary"),
            vmem_limit_bytes=_VMEM_LIMIT,
        ),
        cost_estimate=pl.CostEstimate(
            flops=flops, transcendentals=0, bytes_accessed=bytes_hbm),
    )(x2d)


def _argmax_mid(x3d: jax.Array, *, force_acc: bool = False,
                test_tk: int | None = None) -> jax.Array:
    """Argmax over the middle axis of [outer, K, inner] -> (outer, inner) int32."""
    outer, k_len, inner = x3d.shape
    itemsize = x3d.dtype.itemsize
    cdtype = _compute_dtype(x3d.dtype)
    init_val = _identity_for(cdtype)

    to_min = outer if outer <= 8 else 8
    min_block = to_min * k_len * 128 * itemsize     # smallest possible input block
    use_acc = force_acc or (2 * min_block > _VMEM_BUDGET)

    flops = 2 * outer * k_len * inner
    bytes_hbm = outer * k_len * inner * itemsize + outer * inner * 4

    if not use_acc:
        # Grow the lane tile first, then the outer tile, toward ~_BLOCK_BUDGET
        # per input block so the per-grid-step overhead is amortized.
        if inner >= 128:
            cap = max(128, _floor_to(
                _BLOCK_BUDGET // max(1, to_min * k_len * itemsize), 128))
            ti = inner if inner <= cap else cap     # partial lane tail is OK
        else:
            ti = inner
        per_outer = k_len * _ceil_to(ti, 128) * itemsize
        if outer <= 8:
            to = outer
        else:
            to = _floor_to(_BLOCK_BUDGET // max(1, per_outer), 8)
            to = max(8, min(to, max(8, _floor_to(outer, 8))))
        # v7x megacore: give at least one parallel axis >= 2 blocks when the
        # problem is big enough to matter.
        if (pl.cdiv(outer, to) * pl.cdiv(inner, ti) == 1
                and outer * k_len * inner * itemsize > 2 * 1024 * 1024):
            if inner >= 256:
                ti = max(128, _ceil_to(pl.cdiv(inner, 2), 128))
            elif outer >= 16:
                to = max(8, _ceil_to(pl.cdiv(outer, 2), 8))
        grid = (pl.cdiv(outer, to), pl.cdiv(inner, ti))
        kernel = functools.partial(_argmax_mid_kernel, cdtype=cdtype)
        return pl.pallas_call(
            kernel,
            out_shape=jax.ShapeDtypeStruct((outer, inner), jnp.int32),
            grid_spec=pltpu.PrefetchScalarGridSpec(
                num_scalar_prefetch=0,
                grid=grid,
                in_specs=[pl.BlockSpec((to, k_len, ti),
                                       lambda o, i: (o, 0, i))],
                out_specs=pl.BlockSpec((to, ti), lambda o, i: (o, i)),
            ),
            compiler_params=pltpu.CompilerParams(
                dimension_semantics=("parallel", "parallel"),
                vmem_limit_bytes=_VMEM_LIMIT,
            ),
            cost_estimate=pl.CostEstimate(
                flops=flops, transcendentals=0, bytes_accessed=bytes_hbm),
        )(x3d)

    # ---- K-tiled accumulator path (huge K x inner slabs) ----
    acc_itemsize = 2 if cdtype == jnp.bfloat16 else 4
    to = to_min
    ti = min(512, _floor_to(inner, 128)) if inner >= 128 else inner
    ti_lanes = _ceil_to(ti, 128)
    overhead = to * ti_lanes * (2 * 4 + acc_itemsize + 4)   # DB out + scratch
    in_budget = max(256 * 1024, _VMEM_BUDGET - overhead)
    tk = _floor_to(in_budget // (2 * to * ti_lanes * itemsize), 8)
    tk = max(8, min(tk, 8192, max(8, _floor_to(k_len, 8))))
    if test_tk is not None:
        tk = test_tk
    ragged = (k_len % tk) != 0
    grid = (pl.cdiv(outer, to), pl.cdiv(inner, ti), pl.cdiv(k_len, tk))
    kernel = functools.partial(
        _argmax_mid_acc_kernel, tk=tk, k_len=k_len, cdtype=cdtype,
        init_val=init_val, ragged=ragged)
    return pl.pallas_call(
        kernel,
        out_shape=jax.ShapeDtypeStruct((outer, inner), jnp.int32),
        grid_spec=pltpu.PrefetchScalarGridSpec(
            num_scalar_prefetch=0,
            grid=grid,
            in_specs=[pl.BlockSpec((to, tk, ti), lambda o, i, k: (o, k, i))],
            out_specs=pl.BlockSpec((to, ti), lambda o, i, k: (o, i)),
            scratch_shapes=[pltpu.VMEM((to, ti), cdtype),
                            pltpu.VMEM((to, ti), jnp.int32)],
        ),
        compiler_params=pltpu.CompilerParams(
            dimension_semantics=("parallel", "parallel", "arbitrary"),
            vmem_limit_bytes=_VMEM_LIMIT,
        ),
        cost_estimate=pl.CostEstimate(
            flops=flops, transcendentals=0, bytes_accessed=bytes_hbm),
    )(x3d)


# --------------------------------------------------------------------------
# Public entry point (equivalent of Argmax(dim, keepdim)(x))
# --------------------------------------------------------------------------
def argmax(x: jax.Array, dim: int = -1, keepdim: bool = False) -> jax.Array:
    """JAX/Pallas equivalent of Argmax(dim, keepdim)(x).  Returns int32 indices."""
    ndim = x.ndim
    dim = dim % ndim
    k_len = x.shape[dim]
    outer = math.prod(x.shape[:dim])
    inner = math.prod(x.shape[dim + 1:])
    out_dims = tuple(s for a, s in enumerate(x.shape) if a != dim)

    if k_len == 1 or x.size == 0:
        idx = jnp.zeros(out_dims, jnp.int32)
    elif inner == 1:
        # Reduction axis is minor: free reshape to [rows, K] (no transpose).
        idx = _argmax_last(x.reshape(outer, k_len))[:, 0].reshape(out_dims)
    else:
        # Reduction axis is not minor: free reshape to [outer, K, inner]; the
        # kernel reduces K in place -- single HBM pass, no wrapper transpose.
        idx = _argmax_mid(x.reshape(outer, k_len, inner)).reshape(out_dims)

    if keepdim:
        idx = jnp.expand_dims(idx, dim)
    return idx


if __name__ == "__main__":
    key = jax.random.PRNGKey(0)
    x = jax.random.normal(key, (2, 4, 16, 16), dtype=jnp.float32)   # NCHW

    # Module default: dim=-1, keepdim=False  (last-axis kernel).
    y = jax.block_until_ready(argmax(x, dim=-1, keepdim=False))
    ref = jnp.argmax(x, axis=-1).astype(jnp.int32)
    assert y.shape == ref.shape and y.dtype == jnp.int32
    assert bool(jnp.all(y == ref)), "mismatch vs jnp.argmax (dim=-1)"

    # Non-minor dim + keepdim  (vectorized middle-axis kernel, lane-dense out).
    y2 = jax.block_until_ready(argmax(x, dim=1, keepdim=True))
    ref2 = jnp.argmax(x, axis=1, keepdims=True).astype(jnp.int32)
    assert y2.shape == ref2.shape and bool(jnp.all(y2 == ref2)), "mismatch (dim=1)"

    # Larger batch: multi-step row grid (>= 8 parallel row blocks).
    xb = jax.random.normal(jax.random.PRNGKey(1), (512, 4, 16, 16), jnp.float32)
    yb = jax.block_until_ready(argmax(xb, dim=-1))
    assert bool(jnp.all(yb == jnp.argmax(xb, axis=-1).astype(jnp.int32)))

    # Middle-axis path with outer > 8 (TO grows in multiples of 8).
    xm = jax.random.normal(jax.random.PRNGKey(2), (16, 4, 256), jnp.float32)
    ym = jax.block_until_ready(argmax(xm, dim=1))
    assert bool(jnp.all(ym == jnp.argmax(xm, axis=1).astype(jnp.int32)))

    # Middle-axis path with small, lane-unaligned inner / dim=0.
    xu = jax.random.normal(jax.random.PRNGKey(3), (3, 7, 200), jnp.float32)
    yu = jax.block_until_ready(argmax(xu, dim=1))
    assert bool(jnp.all(yu == jnp.argmax(xu, axis=1).astype(jnp.int32)))
    x0 = jax.random.normal(jax.random.PRNGKey(4), (4, 6), jnp.float32)
    y0 = jax.block_until_ready(argmax(x0, dim=0))
    assert bool(jnp.all(y0 == jnp.argmax(x0, axis=0).astype(jnp.int32)))

    # bf16 input (no f32 widening on v6e/v7x) and a 1-D input.
    xh = jax.random.normal(jax.random.PRNGKey(5), (64, 300)).astype(jnp.bfloat16)
    yh = jax.block_until_ready(argmax(xh, dim=-1))
    assert bool(jnp.all(yh == jnp.argmax(xh, axis=-1).astype(jnp.int32)))
    x1 = jax.random.normal(jax.random.PRNGKey(6), (37,), jnp.float32)
    y1 = jax.block_until_ready(argmax(x1, dim=0))
    assert int(y1) == int(jnp.argmax(x1))

    # Integer input with ties: first-occurrence tie-break like torch.argmax.
    xi = jnp.array([[1, 3, 3, 2], [5, 5, 0, 1]], dtype=jnp.int32)
    yi = jax.block_until_ready(argmax(xi, dim=1))
    assert yi.tolist() == [1, 0]

    # Force the K-tiled last-axis accumulator path at small shape (exercises
    # the in-kernel ragged-K masking that replaced the jnp.pad HBM copy).
    xa = jax.random.normal(jax.random.PRNGKey(7), (16, 300), jnp.float32)
    ya = jax.block_until_ready(_argmax_last(xa, force_acc=True, test_tk=128))
    assert bool(jnp.all(ya[:, 0] == jnp.argmax(xa, axis=-1).astype(jnp.int32)))

    # Force the K-tiled middle-axis accumulator path (ragged K + partial lane
    # blocks with unaligned inner).
    xc = jax.random.normal(jax.random.PRNGKey(8), (4, 300, 160), jnp.float32)
    yc = jax.block_until_ready(_argmax_mid(xc, force_acc=True, test_tk=64))
    assert bool(jnp.all(yc == jnp.argmax(xc, axis=1).astype(jnp.int32)))

    print("KERNEL_OK")
</pallas_src>

<mosaic_0001>
module attributes {stable_mosaic.version = 11 : i64} {
  func.func @_argmax_last_kernel(%arg0: i32, %arg1: memref<128x16xf32, #tpu.memory_space<vmem>>, %arg2: memref<128x1xi32, #tpu.memory_space<vmem>>) attributes {dimension_semantics = [#tpu.dimension_semantics<parallel>], iteration_bounds = array<i64: 1>, scalar_prefetch = 0 : i64, scratch_operands = 0 : i64, tpu.core_type = #tpu.core_type<tc>, window_params = [{transform_indices = @transform_0, window_bounds = array<i64: 128, 16>}, {transform_indices = @transform_1, window_bounds = array<i64: 128, 1>}]} {
    %c0 = arith.constant 0 : index
    %c0_0 = arith.constant 0 : index
    %0 = vector.load %arg1[%c0, %c0_0] : memref<128x16xf32, #tpu.memory_space<vmem>>, vector<128x16xf32>
    %cst = arith.constant dense<0xFF800000> : vector<128xf32>
    %1 = vector.multi_reduction <maximumf>, %0, %cst [1] : vector<128x16xf32> to vector<128xf32>
    %2 = vector.shape_cast %1 : vector<128xf32> to vector<128x1xf32>
    %3 = tpu.iota {dimensions = array<i32: 1>} : vector<1x16xi32>
    %4 = vector.broadcast %2 : vector<128x1xf32> to vector<128x16xf32>
    %5 = arith.cmpf oeq, %0, %4 : vector<128x16xf32>
    %c16_i32 = arith.constant 16 : i32
    %6 = vector.shape_cast %3 : vector<1x16xi32> to vector<1x16xi32>
    %7 = vector.broadcast %6 : vector<1x16xi32> to vector<128x16xi32>
    %8 = vector.broadcast %c16_i32 : i32 to vector<128x16xi32>
    %9 = arith.select %5, %7, %8 : vector<128x16xi1>, vector<128x16xi32>
    %cst_1 = arith.constant dense<2147483647> : vector<128xi32>
    %10 = vector.multi_reduction <minsi>, %9, %cst_1 [1] : vector<128x16xi32> to vector<128xi32>
    %11 = vector.shape_cast %10 : vector<128xi32> to vector<128x1xi32>
    %c0_2 = arith.constant 0 : index
    %c0_3 = arith.constant 0 : index
    %12 = vector.load %arg2[%c0_2, %c0_3] : memref<128x1xi32, #tpu.memory_space<vmem>>, vector<128x1xi32>
    tpu.vector_store %arg2[%c0_2, %c0_3], %11 {strides = array<i32>} : memref<128x1xi32, #tpu.memory_space<vmem>>, vector<128x1xi32>,
    return
  }
  func.func @transform_0(%arg0: i32) -> (i32, i32) {
    %c0_i32 = arith.constant 0 : i32
    %c0_i32_0 = arith.constant 0 : i32
    return %arg0, %c0_i32 : i32, i32
  }
  func.func @transform_1(%arg0: i32) -> (i32, i32) {
    %c0_i32 = arith.constant 0 : i32
    %c0_i32_0 = arith.constant 0 : i32
    return %arg0, %c0_i32 : i32, i32
  }
}

</mosaic_0001>

<bundles_post_ra>
// kernel: tpu_custom_call.1
= control target key start
LH: loop header
LB: loop body
LE: loop exit
PB: predicated region body
PF: predicated region fallthrough
CT: control target
= control target key end

     0   :  { %6 = vsyncpa [#allocation3], 0  ;;  %s802_s0 = inlined_call_operand.hbm [shape: f32[128,16], index: 0, kind: input, shape index: {}]   ;;  %s803_s1 = inlined_call_operand.hbm [shape: s32[128,1], index: 1, kind: output, shape index: {}]  }
   0x1   :  { %7 = vsyncpa [#allocation4], 0  ;;  %s448_s6 = smov [#allocation2]   ;;  %s400_s10 = scalar_lea.hbm %s802_s0, 2048 }
   0x2   :  { %s13_s7 = sshll.u32 %s448_s6, 4  ;;  %p401_p0 = scmp.ne.s32.totalorder %s802_s0, %s400_s10  ;;  %s14_s7 = int_to_ptr.vmem [resolvable:$true] %s13_s7 }
   0x3   :  { %p404_p1 = scmp.lt.u32.totalorder %s400_s10, %s802_s0 }
   0x5   :  { %p406_p2 = pnand %p404_p1, %p401_p0 }
   0x7   :  { %409 = shalt.err (!%p406_p2)
}
   0x8   :  { %s410_s15 = scalar_lea.vmem %s14_s7, 2048  ;;  %p415_p4 = scmp.lt.s32.totalorder %s14_s7, %s14_s7 }
   0x9   :  { %p411_p3 = scmp.ne.s32.totalorder %s14_s7, %s410_s15  ;;  %p416_p5 = scmp.lt.s32.totalorder %s410_s15, %s410_s15 }
   0xb   :  { %p417_p6 = por %p416_p5, %p415_p4 }
   0xd   :  { %p418_p7 = pnand %p417_p6, %p411_p3 }
   0xf   :  { %421 = shalt.err (!%p418_p7)
}
  0x10   :  { %s449_s16 = smov 128   ;;  %s450_s17 = smov 8  }
  0x11   :  { %19 = dma.hbm_to_vmem [thread:$0]  %s802_s0, 2048, %s14_s7, [#allocation3], %s449_s16, %s449_s16, %s450_s17  }
  0x12   :  { %444 = dma.done.wait [#allocation3], 2048  }
  0x13   :  { %445 = vsyncadd [#allocation3], 4294965248  ;;  %vm39_vm0 = vcmask 130048   ;;  %v23_v0 = vld [vmem:[#allocation2] sm:$0xff]  ;;  %v25_v1 = vld [vmem:[#allocation2 + $0x10] sm:$0xff]  ;;  %v88_v32 = vlaneseq  ;;  %s451_s0 = smov [#allocation5]  }
  0x14   :  { %v477_v2 = vld [vmem:[#allocation2 + $0x8] sm:$0xff]  ;;  %v40_v3 = vsel %vm39_vm0, %v23_v0, -inf  ;;  %v46_v4 = vsel %vm39_vm0, %v25_v1, -inf  ;;  %v26_v5 = vld [vmem:[#allocation2 + $0x18] sm:$0xff]  ;;  %v484_v8 = vld [vmem:[#allocation2 + $0x20] sm:$0xff]  ;;  %s384_s20 = sshll.u32 %s451_s0, 4  ;;  %s385_s20 = int_to_ptr.vmem [resolvable:$true] %s384_s20 }
  0x15   :  { %41 = vmax.xlane.f32.xlu0 %v40_v3  ;;  %47 = vmax.xlane.f32.xlu1 %v46_v4  ;;  %v43_v6 = vsel %vm39_vm0, %v477_v2, -inf  ;;  %v49_v7 = vsel %vm39_vm0, %v26_v5, -inf  ;;  %v486_v9 = vld [vmem:[#allocation2 + $0x28] sm:$0xff]  ;;  %v52_v10 = vsel %vm39_vm0, %v484_v8, -inf  ;;  %v492_v12 = vld [vmem:[#allocation2 + $0x30] sm:$0xff]  ;;  %v494_v13 = vld [vmem:[#allocation2 + $0x38] sm:$0xff]  ;;  %p427_p9 = scmp.lt.s32.totalorder %s385_s20, %s385_s20 }
  0x16   :  { %v55_v11 = vsel %vm39_vm0, %v486_v9, -inf  ;;  %v58_v14 = vsel %vm39_vm0, %v492_v12, -inf  ;;  %v61_v15 = vsel %vm39_vm0, %v494_v13, -inf  ;;  %v500_v16 = vld [vmem:[#allocation2 + $0x40] sm:$0xff]  ;;  %v502_v17 = vld [vmem:[#allocation2 + $0x48] sm:$0xff]  ;;  %v508_v20 = vld [vmem:[#allocation2 + $0x50] sm:$0xff] }
  0x17   :  { %v64_v18 = vsel %vm39_vm0, %v500_v16, -inf  ;;  %v67_v19 = vsel %vm39_vm0, %v502_v17, -inf  ;;  %v510_v21 = vld [vmem:[#allocation2 + $0x58] sm:$0xff]  ;;  %v70_v22 = vsel %vm39_vm0, %v508_v20, -inf  ;;  %v516_v24 = vld [vmem:[#allocation2 + $0x60] sm:$0xff]  ;;  %v518_v25 = vld [vmem:[#allocation2 + $0x68] sm:$0xff] }
  0x18   :  { %v73_v23 = vsel %vm39_vm0, %v510_v21, -inf  ;;  %v76_v26 = vsel %vm39_vm0, %v516_v24, -inf  ;;  %v79_v27 = vsel %vm39_vm0, %v518_v25, -inf  ;;  %v524_v28 = vld [vmem:[#allocation2 + $0x70] sm:$0xff]  ;;  %v526_v29 = vld [vmem:[#allocation2 + $0x78] sm:$0xff]  ;;  %v532_v33 = vand.u32 127, %v88_v32 }
  0x19   :  { %44 = vmax.xlane.f32.xlu0 %v43_v6  ;;  %50 = vmax.xlane.f32.xlu1 %v49_v7  ;;  %v82_v30 = vsel %vm39_vm0, %v524_v28, -inf  ;;  %v85_v31 = vsel %vm39_vm0, %v526_v29, -inf  ;;  %s422_s21 = scalar_lea.vmem %s385_s20, 2048 }
  0x1a   :  { %p423_p8 = scmp.ne.s32.totalorder %s385_s20, %s422_s21  ;;  %p428_p10 = scmp.lt.s32.totalorder %s422_s21, %s422_s21 }
  0x1c   :  { %p429_p11 = por %p428_p10, %p427_p9 }
  0x1d   :  { %53 = vmax.xlane.f32.xlu0 %v52_v10  ;;  %56 = vmax.xlane.f32.xlu1 %v55_v11 }
  0x1e   :  { %p430_p12 = pnand %p429_p11, %p423_p8 }
  0x21   :  { %59 = vmax.xlane.f32.xlu0 %v58_v14  ;;  %62 = vmax.xlane.f32.xlu1 %v61_v15 }
  0x25   :  { %65 = vmax.xlane.f32.xlu0 %v64_v18  ;;  %68 = vmax.xlane.f32.xlu1 %v67_v19 }
  0x29   :  { %71 = vmax.xlane.f32.xlu0 %v70_v22  ;;  %74 = vmax.xlane.f32.xlu1 %v73_v23 }
  0x2d   :  { %77 = vmax.xlane.f32.xlu0 %v76_v26  ;;  %80 = vmax.xlane.f32.xlu1 %v79_v27 }
  0x31   :  { %83 = vmax.xlane.f32.xlu0 %v82_v30  ;;  %86 = vmax.xlane.f32.xlu1 %v85_v31 }
  0xa2   :  { %v42_v34 = vpop.xlane.xlu0 %41  ;;  %v48_v35 = vpop.xlane.xlu1 %47 }
  0xa3   :  { %vm90_vm1 = vcmp.eq.f32.partialorder %v23_v0, %v42_v34  ;;  %vm92_vm2 = vcmp.eq.f32.partialorder %v25_v1, %v48_v35 }
  0xa4   :  { %v106_v36 = vsel %vm90_vm1, %v532_v33, 16  ;;  %v108_v37 = vsel %vm92_vm2, %v532_v33, 16 }
  0xa5   :  { %v537_v38 = vsel %vm39_vm0, %v106_v36, 2147483647  ;;  %v540_v39 = vsel %vm39_vm0, %v108_v37, 2147483647 }
  0xa6   :  { %v45_v40 = vpop.xlane.xlu0 %44  ;;  %v51_v41 = vpop.xlane.xlu1 %50  ;;  %v124_v42 = vshra.s32 %v537_v38, 16  ;;  %v154_v43 = vshra.s32 %v540_v39, 16 }
  0xa7   :  { %vm91_vm3 = vcmp.eq.f32.partialorder %v477_v2, %v45_v40  ;;  %vm93_vm4 = vcmp.eq.f32.partialorder %v26_v5, %v51_v41 }
  0xa8   :  { %v107_v44 = vsel %vm91_vm3, %v532_v33, 16  ;;  %v109_v45 = vsel %vm93_vm4, %v532_v33, 16  ;;  %v547_v46 = vcvt.s32.f32 %v124_v42  ;;  %v556_v51 = vcvt.s32.f32 %v154_v43 }
  0xa9   :  { %v550_v47 = vsel %vm39_vm0, %v107_v44, 2147483647  ;;  %v553_v48 = vsel %vm39_vm0, %v109_v45, 2147483647 }
  0xaa   :  { %127 = vmin.xlane.f32.xlu0 %v547_v46  ;;  %v54_v49 = vpop.xlane.xlu0 %53  ;;  %v57_v50 = vpop.xlane.xlu1 %56  ;;  %v139_v52 = vshra.s32 %v550_v47, 16  ;;  %v169_v53 = vshra.s32 %v553_v48, 16 }
  0xab   :  { %vm94_vm5 = vcmp.eq.f32.partialorder %v484_v8, %v54_v49  ;;  %vm95_vm6 = vcmp.eq.f32.partialorder %v486_v9, %v57_v50 }
  0xac   :  { %v110_v54 = vsel %vm94_vm5, %v532_v33, 16  ;;  %v111_v55 = vsel %vm95_vm6, %v532_v33, 16  ;;  %v564_v56 = vcvt.s32.f32 %v139_v52  ;;  %v574_v61 = vcvt.s32.f32 %v169_v53 }
  0xad   :  { %v567_v57 = vsel %vm39_vm0, %v110_v54, 2147483647  ;;  %v570_v58 = vsel %vm39_vm0, %v111_v55, 2147483647 }
  0xae   :  { %157 = vmin.xlane.f32.xlu0 %v556_v51  ;;  %142 = vmin.xlane.f32.xlu1 %v564_v56  ;;  %v60_v59 = vpop.xlane.xlu0 %59  ;;  %v63_v60 = vpop.xlane.xlu1 %62  ;;  %v184_v62 = vshra.s32 %v567_v57, 16  ;;  %v199_v63 = vshra.s32 %v570_v58, 16 }
  0xaf   :  { %vm96_vm7 = vcmp.eq.f32.partialorder %v492_v12, %v60_v59  ;;  %vm97_vm8 = vcmp.eq.f32.partialorder %v494_v13, %v63_v60  ;;  %v123_v59 = vand.u32 65535, %v537_v38  ;;  %v168_v38 = vand.u32 65535, %v553_v48 }
  0xb0   :  { %v112_v0 = vsel %vm96_vm7, %v532_v33, 16  ;;  %v113_v1 = vsel %vm97_vm8, %v532_v33, 16  ;;  %v582_v2 = vcvt.s32.f32 %v184_v62  ;;  %v592_v7 = vcvt.s32.f32 %v199_v63 }
  0xb1   :  { %v585_v3 = vsel %vm39_vm0, %v112_v0, 2147483647  ;;  %v588_v4 = vsel %vm39_vm0, %v113_v1, 2147483647  ;;  %v125_v62 = vcvt.s32.f32 %v123_v59  ;;  %v138_v63 = vand.u32 65535, %v550_v47 }
  0xb2   :  { %172 = vmin.xlane.f32.xlu1 %v574_v61  ;;  %187 = vmin.xlane.f32.xlu0 %v582_v2  ;;  %v66_v5 = vpop.xlane.xlu0 %65  ;;  %v69_v6 = vpop.xlane.xlu1 %68  ;;  %v214_v8 = vshra.s32 %v585_v3, 16  ;;  %v229_v9 = vshra.s32 %v588_v4, 16  ;;  %v153_v0 = vand.u32 65535, %v540_v39  ;;  %v198_v48 = vand.u32 65535, %v570_v58 }
  0xb3   :  { %vm98_vm9 = vcmp.eq.f32.partialorder %v500_v16, %v66_v5  ;;  %vm99_vm10 = vcmp.eq.f32.partialorder %v502_v17, %v69_v6  ;;  %v228_v58 = vand.u32 65535, %v588_v4 }
  0xb4   :  { %v114_v10 = vsel %vm98_vm9, %v532_v33, 16  ;;  %v115_v11 = vsel %vm99_vm10, %v532_v33, 16  ;;  %v600_v12 = vcvt.s32.f32 %v214_v8  ;;  %v610_v18 = vcvt.s32.f32 %v229_v9 }
  0xb5   :  { %v603_v13 = vsel %vm39_vm0, %v114_v10, 2147483647  ;;  %v606_v14 = vsel %vm39_vm0, %v115_v11, 2147483647  ;;  %v140_v8 = vcvt.s32.f32 %v138_v63  ;;  %v155_v9 = vcvt.s32.f32 %v153_v0 }
  0xb6   :  { %202 = vmin.xlane.f32.xlu1 %v592_v7  ;;  %217 = vmin.xlane.f32.xlu0 %v600_v12  ;;  %v72_v15 = vpop.xlane.xlu0 %71  ;;  %v75_v16 = vpop.xlane.xlu1 %74  ;;  %v244_v17 = vshra.s32 %v603_v13, 16  ;;  %v259_v19 = vshra.s32 %v606_v14, 16  ;;  %v183_v10 = vand.u32 65535, %v567_v57  ;;  %v213_v57 = vand.u32 65535, %v585_v3 }
  0xb7   :  { %vm100_vm11 = vcmp.eq.f32.partialorder %v508_v20, %v72_v15  ;;  %vm101_vm12 = vcmp.eq.f32.partialorder %v510_v21, %v75_v16  ;;  %v170_v15 = vcvt.s32.f32 %v168_v38  ;;  %v243_v3 = vand.u32 65535, %v603_v13 }
  0xb8   :  { %v116_v22 = vsel %vm100_vm11, %v532_v33, 16  ;;  %v117_v23 = vsel %vm101_vm12, %v532_v33, 16  ;;  %v618_v26 = vcvt.s32.f32 %v244_v17  ;;  %v628_v32 = vcvt.s32.f32 %v259_v19 }
  0xb9   :  { %v621_v27 = vsel %vm39_vm0, %v116_v22, 2147483647  ;;  %v624_v30 = vsel %vm39_vm0, %v117_v23, 2147483647  ;;  %v185_v16 = vcvt.s32.f32 %v183_v10  ;;  %v200_v22 = vcvt.s32.f32 %v198_v48 }
  0xba   :  { %232 = vmin.xlane.f32.xlu1 %v610_v18  ;;  %247 = vmin.xlane.f32.xlu0 %v618_v26  ;;  %v78_v31 = vpop.xlane.xlu0 %77  ;;  %v81_v20 = vpop.xlane.xlu1 %80  ;;  %v274_v21 = vshra.s32 %v621_v27, 16  ;;  %v289_v34 = vshra.s32 %v624_v30, 16  ;;  %v215_v23 = vcvt.s32.f32 %v213_v57  ;;  %v258_v4 = vand.u32 65535, %v606_v14 }
  0xbb   :  { %vm102_vm13 = vcmp.eq.f32.partialorder %v516_v24, %v78_v31  ;;  %vm103_vm14 = vcmp.eq.f32.partialorder %v518_v25, %v81_v20  ;;  %v273_v13 = vand.u32 65535, %v621_v27  ;;  %v288_v14 = vand.u32 65535, %v624_v30 }
  0xbc   :  { %v118_v35 = vsel %vm102_vm13, %v532_v33, 16  ;;  %v119_v36 = vsel %vm103_vm14, %v532_v33, 16  ;;  %v636_v37 = vcvt.s32.f32 %v274_v21  ;;  %v646_v43 = vcvt.s32.f32 %v289_v34 }
  0xbd   :  { %v639_v40 = vsel %vm39_vm0, %v118_v35, 2147483647  ;;  %v642_v41 = vsel %vm39_vm0, %v119_v36, 2147483647  ;;  %v230_v21 = vcvt.s32.f32 %v228_v58  ;;  %v245_v34 = vcvt.s32.f32 %v243_v3 }
  0xbe   :  { %262 = vmin.xlane.f32.xlu1 %v628_v32  ;;  %277 = vmin.xlane.f32.xlu0 %v636_v37  ;;  %v84_v42 = vpop.xlane.xlu0 %83  ;;  %v87_v24 = vpop.xlane.xlu1 %86  ;;  %v304_v25 = vshra.s32 %v639_v40, 16  ;;  %v319_v44 = vshra.s32 %v642_v41, 16  ;;  %v303_v27 = vand.u32 65535, %v639_v40  ;;  %v318_v30 = vand.u32 65535, %v642_v41 }
  0xbf   :  { %vm104_vm15 = vcmp.eq.f32.partialorder %v524_v28, %v84_v42  ;;  %vm105_vm1 = vcmp.eq.f32.partialorder %v526_v29, %v87_v24  ;;  %v260_v42 = vcvt.s32.f32 %v258_v4  ;;  %v275_v24 = vcvt.s32.f32 %v273_v13 }
  0xc0   :  { %v120_v45 = vsel %vm104_vm15, %v532_v33, 16  ;;  %v121_v49 = vsel %vm105_vm1, %v532_v33, 16  ;;  %v654_v50 = vcvt.s32.f32 %v304_v25  ;;  %v664_v54 = vcvt.s32.f32 %v319_v44 }
  0xc1   :  { %v657_v52 = vsel %vm39_vm0, %v120_v45, 2147483647  ;;  %v660_v53 = vsel %vm39_vm0, %v121_v49, 2147483647  ;;  %v290_v45 = vcvt.s32.f32 %v288_v14  ;;  %v305_v49 = vcvt.s32.f32 %v303_v27 }
  0xc2   :  { %292 = vmin.xlane.f32.xlu1 %v646_v43  ;;  %307 = vmin.xlane.f32.xlu0 %v654_v50  ;;  %v334_v28 = vshra.s32 %v657_v52, 16  ;;  %v349_v29 = vshra.s32 %v660_v53, 16  ;;  %v333_v40 = vand.u32 65535, %v657_v52  ;;  %v320_v59 = vcvt.s32.f32 %v318_v30 }
  0xc3   :  { %v348_v41 = vand.u32 65535, %v660_v53 }
  0xc4   :  { %v668_v55 = vcvt.s32.f32 %v334_v28  ;;  %v672_v33 = vcvt.s32.f32 %v349_v29 }
  0xc5   :  { %v350_v63 = vcvt.s32.f32 %v348_v41 }
  0xc6   :  { %322 = vmin.xlane.f32.xlu1 %v664_v54  ;;  %337 = vmin.xlane.f32.xlu0 %v668_v55 }
  0xca   :  { %352 = vmin.xlane.f32.xlu1 %v672_v33 }
 0x137   :  { %v676_v60 = vpop.xlane.xlu0 %127 }
 0x138   :  { %vm129_vm0 = vcmp.eq.f32.partialorder %v547_v46, %v676_v60  ;;  %v134_v53 = vcvt.f32.s32 %v676_v60 }
 0x139   :  { %v130_v1 = vsel %vm129_vm0, %v125_v62, inf  ;;  %v335_v62 = vcvt.s32.f32 %v333_v40  ;;  %vm362_vm0 = vcmask 7168  }
 0x13a   :  { %131 = vmin.xlane.f32.xlu0 %v130_v1 }
 0x13b   :  { %v682_v5 = vpop.xlane.xlu1 %142  ;;  %v684_v6 = vpop.xlane.xlu0 %157 }
 0x13c   :  { %vm144_vm2 = vcmp.eq.f32.partialorder %v564_v56, %v682_v5  ;;  %vm159_vm3 = vcmp.eq.f32.partialorder %v556_v51, %v684_v6  ;;  %v149_v1 = vcvt.f32.s32 %v682_v5 }
 0x13d   :  { %v145_v39 = vsel %vm144_vm2, %v140_v8, inf  ;;  %v160_v46 = vsel %vm159_vm3, %v155_v9, inf  ;;  %v135_v8 = vshll.u32 %v134_v53, 16 }
 0x13e   :  { %146 = vmin.xlane.f32.xlu1 %v145_v39  ;;  %161 = vmin.xlane.f32.xlu0 %v160_v46  ;;  %v150_v10 = vshll.u32 %v149_v1, 16 }
 0x13f   :  { %v692_v47 = vpop.xlane.xlu1 %172  ;;  %v694_v11 = vpop.xlane.xlu0 %187 }
 0x140   :  { %vm174_vm4 = vcmp.eq.f32.partialorder %v574_v61, %v692_v47  ;;  %vm189_vm5 = vcmp.eq.f32.partialorder %v582_v2, %v694_v11  ;;  %v179_v39 = vcvt.f32.s32 %v692_v47 }
 0x141   :  { %v175_v51 = vsel %vm174_vm4, %v170_v15, inf  ;;  %v190_v56 = vsel %vm189_vm5, %v185_v16, inf }
 0x142   :  { %176 = vmin.xlane.f32.xlu1 %v175_v51  ;;  %191 = vmin.xlane.f32.xlu0 %v190_v56  ;;  %v180_v51 = vshll.u32 %v179_v39, 16 }
 0x143   :  { %v702_v17 = vpop.xlane.xlu1 %202  ;;  %v704_v19 = vpop.xlane.xlu0 %217 }
 0x144   :  { %vm204_vm6 = vcmp.eq.f32.partialorder %v592_v7, %v702_v17  ;;  %vm219_vm7 = vcmp.eq.f32.partialorder %v600_v12, %v704_v19  ;;  %v224_v58 = vcvt.f32.s32 %v704_v19 }
 0x145   :  { %v205_v61 = vsel %vm204_vm6, %v200_v22, inf  ;;  %v220_v2 = vsel %vm219_vm7, %v215_v23, inf }
 0x146   :  { %206 = vmin.xlane.f32.xlu1 %v205_v61  ;;  %221 = vmin.xlane.f32.xlu0 %v220_v2  ;;  %v225_v13 = vshll.u32 %v224_v58, 16 }
 0x147   :  { %v712_v31 = vpop.xlane.xlu1 %232  ;;  %v714_v20 = vpop.xlane.xlu0 %247 }
 0x148   :  { %vm234_vm8 = vcmp.eq.f32.partialorder %v610_v18, %v712_v31  ;;  %vm249_vm9 = vcmp.eq.f32.partialorder %v618_v26, %v714_v20 }
 0x149   :  { %v235_v7 = vsel %vm234_vm8, %v230_v21, inf  ;;  %v250_v12 = vsel %vm249_vm9, %v245_v34, inf  ;;  %v239_v21 = vcvt.f32.s32 %v712_v31 }
 0x14a   :  { %236 = vmin.xlane.f32.xlu1 %v235_v7  ;;  %251 = vmin.xlane.f32.xlu0 %v250_v12 }
 0x14b   :  { %v722_v35 = vpop.xlane.xlu1 %262  ;;  %v724_v36 = vpop.xlane.xlu0 %277 }
 0x14c   :  { %vm264_vm10 = vcmp.eq.f32.partialorder %v628_v32, %v722_v35  ;;  %vm279_vm11 = vcmp.eq.f32.partialorder %v636_v37, %v724_v36  ;;  %v269_v14 = vcvt.f32.s32 %v722_v35  ;;  %v284_v31 = vcvt.f32.s32 %v724_v36 }
 0x14d   :  { %v265_v18 = vsel %vm264_vm10, %v260_v42, inf  ;;  %v280_v26 = vsel %vm279_vm11, %v275_v24, inf  ;;  %v240_v24 = vshll.u32 %v239_v21, 16 }
 0x14e   :  { %266 = vmin.xlane.f32.xlu1 %v265_v18  ;;  %281 = vmin.xlane.f32.xlu0 %v280_v26  ;;  %v270_v40 = vshll.u32 %v269_v14, 16 }
 0x14f   :  { %v732_v25 = vpop.xlane.xlu1 %292  ;;  %v734_v44 = vpop.xlane.xlu0 %307 }
 0x150   :  { %vm294_vm12 = vcmp.eq.f32.partialorder %v646_v43, %v732_v25  ;;  %vm309_vm13 = vcmp.eq.f32.partialorder %v654_v50, %v734_v44  ;;  %v314_v35 = vcvt.f32.s32 %v734_v44 }
 0x151   :  { %v295_v32 = vsel %vm294_vm12, %v290_v45, inf  ;;  %v310_v37 = vsel %vm309_vm13, %v305_v49, inf }
 0x152   :  { %296 = vmin.xlane.f32.xlu1 %v295_v32  ;;  %311 = vmin.xlane.f32.xlu0 %v310_v37  ;;  %v299_v32 = vcvt.f32.s32 %v732_v25 }
 0x153   :  { %v742_v28 = vpop.xlane.xlu1 %322  ;;  %v744_v29 = vpop.xlane.xlu0 %337 }
 0x154   :  { %vm324_vm14 = vcmp.eq.f32.partialorder %v664_v54, %v742_v28  ;;  %vm339_vm15 = vcmp.eq.f32.partialorder %v668_v55, %v744_v29  ;;  %v164_v55 = vcvt.f32.s32 %v684_v6  ;;  %v209_v6 = vcvt.f32.s32 %v702_v17 }
 0x155   :  { %v325_v43 = vsel %vm324_vm14, %v320_v59, inf  ;;  %v340_v50 = vsel %vm339_vm15, %v335_v62, inf  ;;  %v254_v17 = vcvt.f32.s32 %v714_v20  ;;  %v285_v62 = vshll.u32 %v284_v31, 16 }
 0x156   :  { %326 = vmin.xlane.f32.xlu1 %v325_v43  ;;  %341 = vmin.xlane.f32.xlu0 %v340_v50  ;;  %v165_v16 = vshll.u32 %v164_v55, 16  ;;  %v210_v2 = vshll.u32 %v209_v6, 16  ;;  %v344_v25 = vcvt.f32.s32 %v744_v29 }
 0x157   :  { %v751_v52 = vpop.xlane.xlu1 %352  ;;  %v255_v26 = vshll.u32 %v254_v17, 16 }
 0x158   :  { %vm354_vm1 = vcmp.eq.f32.partialorder %v672_v33, %v751_v52  ;;  %v194_v33 = vcvt.f32.s32 %v694_v11 }
 0x159   :  { %v355_v0 = vsel %vm354_vm1, %v350_v63, inf  ;;  %v300_v63 = vshll.u32 %v299_v32, 16 }
 0x15a   :  { %356 = vmin.xlane.f32.xlu1 %v355_v0  ;;  %v195_v23 = vshll.u32 %v194_v33, 16  ;;  %v329_v0 = vcvt.f32.s32 %v742_v28 }
 0x1c7   :  { %v132_v54 = vpop.xlane.xlu0 %131 }
 0x1c8   :  { %v133_v9 = vcvt.f32.s32 %v132_v54  ;;  %v315_v54 = vshll.u32 %v314_v35, 16 }
 0x1ca   :  { %v136_v38 = vadd.s32 %v135_v8, %v133_v9 }
 0x1cb   :  { %v147_v46 = vpop.xlane.xlu1 %146  ;;  %v162_v15 = vpop.xlane.xlu0 %161 }
 0x1cc   :  { %363 = vst.msk [vmem:[#allocation5] sm:$0xff] %vm362_vm0, %v136_v38  ;;  %v148_v60 = vcvt.f32.s32 %v147_v46  ;;  %v163_v48 = vcvt.f32.s32 %v162_v15  ;;  %v330_v38 = vshll.u32 %v329_v0, 16  ;;  %v345_v46 = vshll.u32 %v344_v25, 16 }
 0x1cd   :  { %v359_v15 = vcvt.f32.s32 %v751_v52 }
 0x1ce   :  { %v151_v5 = vadd.s32 %v150_v10, %v148_v60  ;;  %v166_v57 = vadd.s32 %v165_v16, %v163_v48 }
 0x1cf   :  { %v177_v56 = vpop.xlane.xlu1 %176  ;;  %v192_v22 = vpop.xlane.xlu0 %191  ;;  %v360_v48 = vshll.u32 %v359_v15, 16 }
 0x1d0   :  { %364 = vst.msk [vmem:[#allocation5 + $0x8] sm:$0xff] %vm362_vm0, %v151_v5  ;;  %365 = vst.msk [vmem:[#allocation5 + $0x10] sm:$0xff] %vm362_vm0, %v166_v57  ;;  %v178_v47 = vcvt.f32.s32 %v177_v56  ;;  %v193_v11 = vcvt.f32.s32 %v192_v22 }
 0x1d2   :  { %v181_v3 = vadd.s32 %v180_v51, %v178_v47  ;;  %v196_v61 = vadd.s32 %v195_v23, %v193_v11 }
 0x1d3   :  { %v207_v34 = vpop.xlane.xlu1 %206  ;;  %v222_v4 = vpop.xlane.xlu0 %221 }
 0x1d4   :  { %366 = vst.msk [vmem:[#allocation5 + $0x18] sm:$0xff] %vm362_vm0, %v181_v3  ;;  %367 = vst.msk [vmem:[#allocation5 + $0x20] sm:$0xff] %vm362_vm0, %v196_v61  ;;  %v208_v19 = vcvt.f32.s32 %v207_v34  ;;  %v223_v7 = vcvt.f32.s32 %v222_v4 }
 0x1d6   :  { %v211_v12 = vadd.s32 %v210_v2, %v208_v19  ;;  %v226_v42 = vadd.s32 %v225_v13, %v223_v7 }
 0x1d7   :  { %v237_v27 = vpop.xlane.xlu1 %236  ;;  %v252_v18 = vpop.xlane.xlu0 %251 }
 0x1d8   :  { %368 = vst.msk [vmem:[#allocation5 + $0x28] sm:$0xff] %vm362_vm0, %v211_v12  ;;  %369 = vst.msk [vmem:[#allocation5 + $0x30] sm:$0xff] %vm362_vm0, %v226_v42  ;;  %v238_v20 = vcvt.f32.s32 %v237_v27  ;;  %v253_v45 = vcvt.f32.s32 %v252_v18 }
 0x1da   :  { %v241_v49 = vadd.s32 %v240_v24, %v238_v20  ;;  %v256_v30 = vadd.s32 %v255_v26, %v253_v45 }
 0x1db   :  { %v267_v37 = vpop.xlane.xlu1 %266  ;;  %v282_v59 = vpop.xlane.xlu0 %281 }
 0x1dc   :  { %370 = vst.msk [vmem:[#allocation5 + $0x38] sm:$0xff] %vm362_vm0, %v241_v49  ;;  %371 = vst.msk [vmem:[#allocation5 + $0x40] sm:$0xff] %vm362_vm0, %v256_v30  ;;  %v268_v36 = vcvt.f32.s32 %v267_v37  ;;  %v283_v41 = vcvt.f32.s32 %v282_v59 }
 0x1de   :  { %v271_v43 = vadd.s32 %v270_v40, %v268_v36  ;;  %v286_v50 = vadd.s32 %v285_v62, %v283_v41 }
 0x1df   :  { %v297_v53 = vpop.xlane.xlu1 %296  ;;  %v312_v1 = vpop.xlane.xlu0 %311 }
 0x1e0   :  { %372 = vst.msk [vmem:[#allocation5 + $0x48] sm:$0xff] %vm362_vm0, %v271_v43  ;;  %373 = vst.msk [vmem:[#allocation5 + $0x50] sm:$0xff] %vm362_vm0, %v286_v50  ;;  %v298_v44 = vcvt.f32.s32 %v297_v53  ;;  %v313_v8 = vcvt.f32.s32 %v312_v1 }
 0x1e2   :  { %v301_v55 = vadd.s32 %v300_v63, %v298_v44  ;;  %v316_v9 = vadd.s32 %v315_v54, %v313_v8 }
 0x1e3   :  { %v327_v10 = vpop.xlane.xlu1 %326  ;;  %v342_v39 = vpop.xlane.xlu0 %341 }
 0x1e4   :  { %374 = vst.msk [vmem:[#allocation5 + $0x58] sm:$0xff] %vm362_vm0, %v301_v55  ;;  %375 = vst.msk [vmem:[#allocation5 + $0x60] sm:$0xff] %vm362_vm0, %v316_v9  ;;  %v328_v28 = vcvt.f32.s32 %v327_v10  ;;  %v343_v29 = vcvt.f32.s32 %v342_v39 }
 0x1e6   :  { %v331_v16 = vadd.s32 %v330_v38, %v328_v28  ;;  %v346_v33 = vadd.s32 %v345_v46, %v343_v29 }
 0x1e7   :  { %v357_v60 = vpop.xlane.xlu1 %356 }
 0x1e8   :  { %376 = vst.msk [vmem:[#allocation5 + $0x68] sm:$0xff] %vm362_vm0, %v331_v16  ;;  %377 = vst.msk [vmem:[#allocation5 + $0x70] sm:$0xff] %vm362_vm0, %v346_v33  ;;  %v358_v5 = vcvt.f32.s32 %v357_v60 }
 0x1ea   :  { %v361_v57 = vadd.s32 %v360_v48, %v358_v5 }
 0x1ec   :  { %378 = vst.msk [vmem:[#allocation5 + $0x78] sm:$0xff] %vm362_vm0, %v361_v57 }
 0x1ed   :  { %433 = shalt.err (!%p430_p12)
}
 0x1ee   :  { %s434_s24 = scalar_lea.hbm %s803_s1, 2048 }
 0x1ef   :  { %p435_p13 = scmp.ne.s32.totalorder %s803_s1, %s434_s24  ;;  %p438_p0 = scmp.lt.u32.totalorder %s434_s24, %s803_s1 }
 0x1f1   :  { %p440_p1 = pnand %p438_p0, %p435_p13 }
 0x1f3   :  { %443 = shalt.err (!%p440_p1)
}
 0x1f4   :  { %390 = dma.vmem_to_hbm [thread:$0]  %s385_s20, 2048, %s803_s1, [#allocation4], %s449_s16, %s449_s16, %s450_s17  }
 0x1f5   :  { %446 = dma.done.wait [#allocation4], 2048  }
 0x1f6   :  { %447 = vsyncadd [#allocation4], 4294965248 }
 0x1f7   :  { %394 = vsyncpa [#allocation3], 1 }
 0x1f8   :  { %395 = vsyncpa [#allocation4], 1 }

</bundles_post_ra>
